<compile_context>
chip_gen: v5e
topology: v5e:2x2
jax: 0.10.0
libtpu: 0.0.40
codegen_flags: <defaults>
</compile_context>

<pallas_src>
import functools
import math

import jax
import jax.numpy as jnp
from jax.experimental import pallas as pl
from jax.experimental.pallas import tpu as pltpu


# ---------------------------------------------------------------------------
# Parameter / buffer setup (glue, plain JAX) — mirrors PositionalEncoding.__init__
# ---------------------------------------------------------------------------
def make_positional_encoding_table(d_model: int, max_len: int = 5000) -> jnp.ndarray:
    position = jnp.arange(max_len, dtype=jnp.float32)[:, None]               # (max_len, 1)
    div_term = jnp.exp(
        jnp.arange(0, d_model, 2, dtype=jnp.float32) * (-math.log(10000.0) / d_model)
    )                                                                         # (ceil(d/2),)
    pe = jnp.zeros((max_len, 1, d_model), dtype=jnp.float32)
    pe = pe.at[:, 0, 0::2].set(jnp.sin(position * div_term))
    pe = pe.at[:, 0, 1::2].set(jnp.cos(position * div_term)[..., : d_model // 2])
    return pe                                                                 # (max_len, 1, d_model)


# ---------------------------------------------------------------------------
# Pallas kernels
# ---------------------------------------------------------------------------
def _pe_add_kernel(x_ref, pe_ref, o_ref):
    # x_ref: (TS, B, D), pe_ref: (TS, 1, D) -> broadcast add over the batch axis
    o_ref[...] = (x_ref[...] + pe_ref[...]).astype(o_ref.dtype)


def _pe_add_dropout_kernel(x_ref, pe_ref, mask_ref, o_ref, *, scale):
    # torch.nn.Dropout (training): zero with prob p, scale survivors by 1/(1-p).
    y = x_ref[...] + pe_ref[...]
    keep = mask_ref[...] != 0
    y = y * jnp.where(keep, scale, 0.0).astype(y.dtype)   # fused select-scale
    o_ref[...] = y.astype(o_ref.dtype)


# ---------------------------------------------------------------------------
# Wrapper
# ---------------------------------------------------------------------------
def _choose_row_tile(S, B, D, itemsize, target_bytes=2 << 20):
    """Pick a sequence-axis tile so each x/out block is ~2 MiB (v7x-safe)."""
    bytes_per_row = max(1, B * D * itemsize)
    ts = max(1, target_bytes // bytes_per_row)
    ts = min(int(ts), S)
    if ts >= 8:
        ts = (ts // 8) * 8
    return int(ts)


def positional_encoding_forward(x, pe, *, p=0.1, training=False, rng_key=None):
    """x: (S, B, D); pe: (max_len, 1, D) float32. Returns dropout(x + pe[:S])."""
    S, B, D = x.shape
    pe_slice = pe[:S].astype(x.dtype)                     # cast once, (S, 1, D)

    itemsize = jnp.dtype(x.dtype).itemsize
    TS = _choose_row_tile(S, B, D, itemsize)
    grid = (pl.cdiv(S, TS),)

    x_spec = pl.BlockSpec((TS, B, D), lambda i: (i, 0, 0))
    pe_spec = pl.BlockSpec((TS, 1, D), lambda i: (i, 0, 0))
    out_spec = pl.BlockSpec((TS, B, D), lambda i: (i, 0, 0))

    use_dropout = training and p > 0.0
    if use_dropout:
        if rng_key is None:
            rng_key = jax.random.PRNGKey(0)
        keep_mask = jax.random.bernoulli(rng_key, 1.0 - p, (S, B, D)).astype(jnp.int8)
        kernel = functools.partial(_pe_add_dropout_kernel, scale=float(1.0 / (1.0 - p)))
        in_specs = [x_spec, pe_spec,
                    pl.BlockSpec((TS, B, D), lambda i: (i, 0, 0))]
        args = (x, pe_slice, keep_mask)
    else:
        kernel = _pe_add_kernel
        in_specs = [x_spec, pe_spec]
        args = (x, pe_slice)

    return pl.pallas_call(
        kernel,
        out_shape=jax.ShapeDtypeStruct((S, B, D), x.dtype),
        grid=grid,
        in_specs=in_specs,
        out_specs=out_spec,
        compiler_params=pltpu.CompilerParams(
            dimension_semantics=("parallel",),            # v7x: shard S-grid over 2 TCs
        ),
    )(*args)


# ---------------------------------------------------------------------------
# Demo / self-check
# ---------------------------------------------------------------------------
if __name__ == "__main__":
    d_model = 32
    seq_len = 8
    batch = 2
    max_len = 5000
    p_drop = 0.1

    key = jax.random.PRNGKey(0)
    k_x, k_drop = jax.random.split(key)
    x = jax.random.normal(k_x, (seq_len, batch, d_model), dtype=jnp.float32)

    pe = make_positional_encoding_table(d_model, max_len)
    ref_eval = x + pe[:seq_len]

    # Eval mode (dropout = identity): exact check against pure-JAX reference.
    out_eval = positional_encoding_forward(x, pe, p=p_drop, training=False)
    out_eval = jax.block_until_ready(out_eval)
    assert out_eval.shape == (seq_len, batch, d_model)
    assert jnp.allclose(out_eval, ref_eval, atol=1e-6), "eval-mode mismatch"

    # Training mode (stochastic dropout with a deterministic JAX key).
    out_train = positional_encoding_forward(x, pe, p=p_drop, training=True, rng_key=k_drop)
    out_train = jax.block_until_ready(out_train)
    assert out_train.shape == (seq_len, batch, d_model)
    # Every element is either exactly zero or (x + pe)/(1 - p).
    scaled = ref_eval / (1.0 - p_drop)
    ok = jnp.logical_or(jnp.isclose(out_train, 0.0, atol=1e-6),
                        jnp.isclose(out_train, scaled, atol=1e-5))
    assert bool(jnp.all(ok)), "training-mode dropout values inconsistent"

    print("KERNEL_OK")
</pallas_src>

<mosaic_0001>
module attributes {stable_mosaic.version = 11 : i64} {
  func.func @_pe_add_kernel(%arg0: i32, %arg1: memref<8x2x32xf32, #tpu.memory_space<vmem>>, %arg2: memref<8x1x32xf32, #tpu.memory_space<vmem>>, %arg3: memref<8x2x32xf32, #tpu.memory_space<vmem>>) attributes {dimension_semantics = [#tpu.dimension_semantics<parallel>], iteration_bounds = array<i64: 1>, scalar_prefetch = 0 : i64, scratch_operands = 0 : i64, tpu.core_type = #tpu.core_type<tc>, window_params = [{transform_indices = @transform_0, window_bounds = array<i64: 8, 2, 32>}, {transform_indices = @transform_1, window_bounds = array<i64: 8, 1, 32>}, {transform_indices = @transform_2, window_bounds = array<i64: 8, 2, 32>}]} {
    %c0 = arith.constant 0 : index
    %c0_0 = arith.constant 0 : index
    %c0_1 = arith.constant 0 : index
    %0 = vector.load %arg1[%c0, %c0_0, %c0_1] : memref<8x2x32xf32, #tpu.memory_space<vmem>>, vector<8x2x32xf32>
    %c0_2 = arith.constant 0 : index
    %c0_3 = arith.constant 0 : index
    %c0_4 = arith.constant 0 : index
    %1 = vector.load %arg2[%c0_2, %c0_3, %c0_4] : memref<8x1x32xf32, #tpu.memory_space<vmem>>, vector<8x1x32xf32>
    %2 = vector.broadcast %1 : vector<8x1x32xf32> to vector<8x2x32xf32>
    %3 = arith.addf %0, %2 : vector<8x2x32xf32>
    %c0_5 = arith.constant 0 : index
    %c0_6 = arith.constant 0 : index
    %c0_7 = arith.constant 0 : index
    %4 = vector.load %arg3[%c0_5, %c0_6, %c0_7] : memref<8x2x32xf32, #tpu.memory_space<vmem>>, vector<8x2x32xf32>
    tpu.vector_store %arg3[%c0_5, %c0_6, %c0_7], %3 {strides = array<i32>} : memref<8x2x32xf32, #tpu.memory_space<vmem>>, vector<8x2x32xf32>,
    return
  }
  func.func @transform_0(%arg0: i32) -> (i32, i32, i32) {
    %c0_i32 = arith.constant 0 : i32
    %c0_i32_0 = arith.constant 0 : i32
    %c0_i32_1 = arith.constant 0 : i32
    return %arg0, %c0_i32, %c0_i32_0 : i32, i32, i32
  }
  func.func @transform_1(%arg0: i32) -> (i32, i32, i32) {
    %c0_i32 = arith.constant 0 : i32
    %c0_i32_0 = arith.constant 0 : i32
    %c0_i32_1 = arith.constant 0 : i32
    return %arg0, %c0_i32, %c0_i32_0 : i32, i32, i32
  }
  func.func @transform_2(%arg0: i32) -> (i32, i32, i32) {
    %c0_i32 = arith.constant 0 : i32
    %c0_i32_0 = arith.constant 0 : i32
    %c0_i32_1 = arith.constant 0 : i32
    return %arg0, %c0_i32, %c0_i32_0 : i32, i32, i32
  }
}

</mosaic_0001>

<bundles_post_ra>
// kernel: tpu_custom_call.1
= control target key start
LH: loop header
LB: loop body
LE: loop exit
PB: predicated region body
PF: predicated region fallthrough
CT: control target
= control target key end

     0   :  { %7 = vsyncpa [#allocation3], 0  ;;  %s266_s0 = inlined_call_operand.hbm [shape: f32[8,2,32], index: 0, kind: input, shape index: {}]   ;;  %s267_s1 = inlined_call_operand.hbm [shape: f32[8,1,32], index: 1, kind: input, shape index: {}]   ;;  %s268_s2 = inlined_call_operand.hbm [shape: f32[8,2,32], index: 2, kind: output, shape index: {}]  }
   0x1   :  { %8 = vsyncpa [#allocation6], 0 }
   0x2   :  { %9 = vsyncpa [#allocation4], 0  ;;  %s14_s11 = sshll.u32 %s266_s0, 4  ;;  %s214_s12 = smov [#allocation2]   ;;  %s15_s11 = int_to_ptr.hbm [resolvable:$true] %s14_s11 }
   0x3   :  { %s16_s13 = sshll.u32 %s214_s12, 4  ;;  %s27_s16 = sshll.u32 %s267_s1, 4  ;;  %s17_s13 = int_to_ptr.vmem [resolvable:$true] %s16_s13  ;;  %s28_s16 = int_to_ptr.hbm [resolvable:$true] %s27_s16 }
   0x4   :  { %s215_s17 = smov 32   ;;  %s216_s18 = smov 2  }
   0x5   :  { %22 = dma.hbm_to_vmem [thread:$0]  %s15_s11, 256, %s17_s13, [#allocation3], %s215_s17, %s215_s17, %s216_s18  }
   0x6   :  { %s217_s19 = smov [#allocation5]   ;;  %s218_s21 = smov 16  }
   0x7   :  { %s29_s20 = sshll.u32 %s217_s19, 4  ;;  %s219_s0 = smov 1   ;;  %s30_s20 = int_to_ptr.vmem [resolvable:$true] %s29_s20 }
   0x8   :  { %35 = dma.hbm_to_vmem [thread:$0]  %s28_s16, 128, %s30_s20, [#allocation6], %s218_s21, %s218_s21, %s219_s0  }
   0x9   :  { %208 = dma.done.wait [#allocation3], 256  }
   0xa   :  { %209 = vsyncadd [#allocation3], 4294967040 }
   0xb   :  { %210 = dma.done.wait [#allocation6], 128  }
   0xc   :  { %211 = vsyncadd [#allocation6], 4294967168  ;;  %vm92_vm0 = vcmask 254976   ;;  %s220_s22 = smov [#allocation7]   ;;  %s107_s25 = sshll.u32 %s268_s2, 4  ;;  %s108_s25 = int_to_ptr.hbm [resolvable:$true] %s107_s25 }
   0xd   :  { %s245_s1 = sshll.u32 %s220_s22, 4  ;;  %v44_v0 = vld [vmem:[#allocation2] sm:$0x3]  ;;  %v128_v1 = vld [vmem:[#allocation5] ss:$0 sm:$0xff]  ;;  %s106_s1 = int_to_ptr.vmem [resolvable:$true] %s245_s1 }
   0xe   :  { %v45_v2 = vld [vmem:[#allocation2 + $0x2] sm:$0x3]  ;;  %v129_v3 = vld [vmem:[#allocation5 + $0x1] ss:$0 sm:$0xff]  ;;  %v84_v4 = vadd.f32 %v128_v1, %v44_v0  ;;  %v46_v5 = vld [vmem:[#allocation2 + $0x4] sm:$0x3] }
   0xf   :  { %v130_v6 = vld [vmem:[#allocation5 + $0x2] ss:$0 sm:$0xff]  ;;  %v85_v7 = vadd.f32 %v129_v3, %v45_v2  ;;  %v47_v8 = vld [vmem:[#allocation2 + $0x6] sm:$0x3]  ;;  %v131_v9 = vld [vmem:[#allocation5 + $0x3] ss:$0 sm:$0xff] }
  0x10   :  { %93 = vst.msk [vmem:[#allocation7] sm:$0x3] %vm92_vm0, %v84_v4  ;;  %v86_v10 = vadd.f32 %v130_v6, %v46_v5  ;;  %v48_v11 = vld [vmem:[#allocation2 + $0x8] sm:$0x3]  ;;  %v87_v12 = vadd.f32 %v131_v9, %v47_v8  ;;  %v132_v13 = vld [vmem:[#allocation5 + $0x4] ss:$0 sm:$0xff] }
  0x11   :  { %94 = vst.msk [vmem:[#allocation7 + $0x2] sm:$0x3] %vm92_vm0, %v85_v7  ;;  %v49_v14 = vld [vmem:[#allocation2 + $0xa] sm:$0x3]  ;;  %v133_v15 = vld [vmem:[#allocation5 + $0x5] ss:$0 sm:$0xff]  ;;  %v88_v16 = vadd.f32 %v132_v13, %v48_v11 }
  0x12   :  { %95 = vst.msk [vmem:[#allocation7 + $0x4] sm:$0x3] %vm92_vm0, %v86_v10  ;;  %v50_v17 = vld [vmem:[#allocation2 + $0xc] sm:$0x3]  ;;  %v89_v18 = vadd.f32 %v133_v15, %v49_v14  ;;  %v134_v19 = vld [vmem:[#allocation5 + $0x6] ss:$0 sm:$0xff] }
  0x13   :  { %96 = vst.msk [vmem:[#allocation7 + $0x6] sm:$0x3] %vm92_vm0, %v87_v12  ;;  %v51_v20 = vld [vmem:[#allocation2 + $0xe] sm:$0x3]  ;;  %v135_v21 = vld [vmem:[#allocation5 + $0x7] ss:$0 sm:$0xff]  ;;  %v90_v22 = vadd.f32 %v134_v19, %v50_v17 }
  0x14   :  { %97 = vst.msk [vmem:[#allocation7 + $0x8] sm:$0x3] %vm92_vm0, %v88_v16  ;;  %v91_v23 = vadd.f32 %v135_v21, %v51_v20 }
  0x15   :  { %98 = vst.msk [vmem:[#allocation7 + $0xa] sm:$0x3] %vm92_vm0, %v89_v18 }
  0x16   :  { %99 = vst.msk [vmem:[#allocation7 + $0xc] sm:$0x3] %vm92_vm0, %v90_v22 }
  0x17   :  { %100 = vst.msk [vmem:[#allocation7 + $0xe] sm:$0x3] %vm92_vm0, %v91_v23 }
  0x18   :  { %113 = dma.vmem_to_hbm [thread:$0]  %s106_s1, 256, %s108_s25, [#allocation4], %s215_s17, %s215_s17, %s216_s18  }
  0x19   :  { %212 = dma.done.wait [#allocation4], 256  }
  0x1a   :  { %213 = vsyncadd [#allocation4], 4294967040 }
  0x1b   :  { %118 = vsyncpa [#allocation3], 1 }
  0x1c   :  { %119 = vsyncpa [#allocation6], 1 }
  0x1d   :  { %120 = vsyncpa [#allocation4], 1 }

</bundles_post_ra>
